<compile_context>
chip_gen: v7x
topology: tpu7x:2x2x1
jax: 0.10.0
libtpu: 0.0.40
codegen_flags: <defaults>
</compile_context>

<pallas_src>
import functools

import jax
import jax.numpy as jnp
from jax import lax
from jax.experimental import pallas as pl
from jax.experimental.pallas import tpu as pltpu


def _esmba_kernel(len_ref, h_ref, w_ref, b_ref, out_ref, emb_acc,
                  *, tb, ts, tc, n_chunks):
    """Grid = (B // tb, S // ts); seq axis (innermost) is the reduction axis.

    len_ref : [tb, 1]  int32   valid-token count per sequence (= mask.sum(1))
    h_ref   : [tb, ts, H]      hidden-state tile (bf16 or f32; upcast here)
    w_ref   : [1, H]   f32     classifier weight (nn.Linear [out, in])
    b_ref   : [1, 1]   f32     classifier bias
    out_ref : [tb, 1]  f32     sigmoid probabilities
    emb_acc : [tb, H]  f32     running masked sum of embeddings (VMEM scratch)
    """
    s = pl.program_id(1)

    @pl.when(s == 0)
    def _init():
        emb_acc[...] = jnp.zeros_like(emb_acc)

    lens = len_ref[...]                         # [tb, 1] int32
    lens3 = lens[:, :, None]                    # [tb, 1, 1]
    base = s * ts                               # first seq position of this tile

    # Stream the masked sum over the seq tile in fixed sub-chunks so no full
    # [tb, ts, H] f32 temporary is materialized in VMEM; the mask is rebuilt
    # from a sublane iota (no lane-padded mask DMA from HBM).
    @pl.loop(0, n_chunks)
    def _chunk(c):
        off = pl.multiple_of(c * tc, 8)
        h = h_ref[:, pl.ds(off, tc), :].astype(jnp.float32)        # [tb, tc, H]
        pos = base + off + lax.broadcasted_iota(jnp.int32, (tb, tc, 1), 1)
        m = (pos < lens3).astype(jnp.float32)                      # [tb, tc, 1]
        emb_acc[...] += jnp.sum(h * m, axis=1)                     # [tb, H]

    @pl.when(s == pl.num_programs(1) - 1)
    def _finalize():
        cnt = lens.astype(jnp.float32)                             # [tb, 1]
        pooled = emb_acc[...] / (cnt + 1e-8)                       # [tb, H]
        # Degenerate [tb,H] x [H,1] head -> VPU multiply + XLU lane reduce
        # (keeps the MXU out of the path).
        logits = jnp.sum(pooled * w_ref[...], axis=-1, keepdims=True)  # [tb, 1]
        logits = logits + b_ref[...]
        out_ref[...] = jax.nn.sigmoid(logits)


def _sublane_multiple(dtype):
    """Packed-sublane tiling multiple: 8 for f32, 16 for bf16, 32 for int8/fp8."""
    return max(8, 32 // jnp.dtype(dtype).itemsize)


def _pick_divisor_tile(extent, target, multiple):
    """Largest t <= target with extent % t == 0 and t % multiple == 0,
    falling back to the full extent (full-extent blocks are always legal)."""
    if extent <= target:
        return extent
    t = (target // multiple) * multiple
    while t >= multiple:
        if extent % t == 0:
            return t
        t -= multiple
    return extent


def _pick_batch_tile(batch, target=8):
    """Batch tile that is either the full batch or a multiple of 8 dividing it
    (keeps the [tb, 1] output / length blocks layout-legal everywhere).
    NOTE(v7x): both TensorCores only get work when B // tb >= 2 (B >= 16 at
    the default tb=8)."""
    if batch <= target:
        return batch
    t = (target // 8) * 8
    while t >= 8:
        if batch % t == 0:
            return t
        t -= 8
    return batch


def esmba_forward(hidden_states, attention_mask, weight, bias, *,
                  tile_b=8, tile_s=None, seq_chunk=64,
                  step_bytes=15 << 20, vmem_limit_bytes=None):
    """hidden_states: [B, S, H] (bf16 or f32 — pass the base model output
    directly, do NOT pre-cast to f32); attention_mask: [B, S] (int/bool/float,
    right-padded prefix mask); weight: [1, H] f32; bias: [1, 1] f32.
    Returns probabilities [B] f32."""
    B, S, H = hidden_states.shape
    assert weight.shape == (1, H), weight.shape
    assert bias.shape == (1, 1), bias.shape

    itemsize = jnp.dtype(hidden_states.dtype).itemsize
    mult = _sublane_multiple(hidden_states.dtype)

    tb = _pick_batch_tile(B, tile_b)
    if tile_s is None:
        # Target ~step_bytes of hidden state per grid step so the ~0.35us
        # per-step pipeline overhead stays small even at v7x HBM speeds
        # (bf16 -> ts ~1024, f32 -> ts ~512 at tb=8, H=960).
        tile_s = max(mult, (step_bytes // (tb * H * itemsize)) // mult * mult)
    ts = _pick_divisor_tile(S, tile_s, mult)
    tc = _pick_divisor_tile(ts, max(seq_chunk, mult), mult)   # in-kernel chunk
    n_chunks = ts // tc
    grid = (B // tb, S // ts)

    # Per-sequence valid-token counts. For the standard right-padded prefix
    # mask this fully determines the mask, which is rebuilt in-kernel from an
    # iota (removes the 128x lane-padded [B, S, 1] mask column entirely).
    lengths = attention_mask.astype(jnp.int32).sum(axis=-1).reshape(B, 1)

    if vmem_limit_bytes is None:
        hid_bytes = tb * ts * H * itemsize
        chunk_tmp = tb * tc * H * 4
        need = 2 * hid_bytes + 3 * chunk_tmp + tb * H * 4 + (4 << 20)
        # Floor at the 16 MiB default, cap well under v7x's 64 MiB physical.
        vmem_limit_bytes = int(min(max(need, 16 << 20), 48 << 20))

    cost = pl.CostEstimate(
        flops=3 * B * S * H,            # mask compare/mul + accumulate (+ head)
        transcendentals=B,              # sigmoid
        bytes_accessed=B * S * H * itemsize + B * 8 + H * 4,
    )

    kernel = functools.partial(_esmba_kernel, tb=tb, ts=ts, tc=tc,
                               n_chunks=n_chunks)

    out = pl.pallas_call(
        kernel,
        out_shape=jax.ShapeDtypeStruct((B, 1), jnp.float32),
        grid_spec=pltpu.PrefetchScalarGridSpec(
            num_scalar_prefetch=0,
            grid=grid,
            in_specs=[
                pl.BlockSpec((tb, 1), lambda b, s: (b, 0)),         # lengths
                pl.BlockSpec((tb, ts, H), lambda b, s: (b, s, 0)),  # hidden tile
                pl.BlockSpec((1, H), lambda b, s: (0, 0)),          # weight
                pl.BlockSpec((1, 1), lambda b, s: (0, 0)),          # bias
            ],
            out_specs=pl.BlockSpec((tb, 1), lambda b, s: (b, 0)),
            scratch_shapes=[
                pltpu.VMEM((tb, H), jnp.float32),   # masked-sum accumulator
            ],
        ),
        compiler_params=pltpu.CompilerParams(
            dimension_semantics=("parallel", "arbitrary"),
            vmem_limit_bytes=vmem_limit_bytes,
        ),
        cost_estimate=cost,
    )(lengths, hidden_states, weight, bias)
    return out[:, 0]  # .squeeze(-1)


def init_classifier_params(key, hidden_dim=960, gain=0.01):
    """Deterministic init matching the module's __init__:
    xavier_uniform_(weight, gain=0.01), uniform_(bias, 0, 1)."""
    k_w, k_b = jax.random.split(key)
    fan_in, fan_out = hidden_dim, 1
    limit = gain * jnp.sqrt(6.0 / (fan_in + fan_out))
    weight = jax.random.uniform(k_w, (1, hidden_dim), jnp.float32,
                                minval=-limit, maxval=limit)
    bias = jax.random.uniform(k_b, (1, 1), jnp.float32, minval=0.0, maxval=1.0)
    return weight, bias


if __name__ == "__main__":
    key = jax.random.PRNGKey(0)
    k_hidden, k_params = jax.random.split(key, 2)

    # H is fixed at 960 by classifier_head = nn.Linear(960, 1).
    B, S, H = 2, 64, 960

    # Stand-in for base_model.forward(...).hidden_states[-1].
    h_f32 = jax.random.normal(k_hidden, (B, S, H), dtype=jnp.float32)
    lengths = jnp.array([S, S - 9], dtype=jnp.int32)
    attention_mask = (jnp.arange(S)[None, :] < lengths[:, None]).astype(jnp.int32)

    weight, bias = init_classifier_params(k_params, hidden_dim=H)

    def reference(h):
        m = attention_mask.astype(jnp.float32)[:, :, None]
        hf = h.astype(jnp.float32)
        pooled = (hf * m).sum(axis=1) / (m.sum(axis=1) + 1e-8)
        return jax.nn.sigmoid(pooled @ weight.T + bias)[:, 0]

    # Production path: bf16 hidden states fed directly, upcast in-kernel.
    # Small tiles so the streamed seq reduction (grid seq axis) AND the
    # in-kernel chunk loop are both exercised: ts=32, chunk=16 -> 2 grid
    # steps x 2 chunks.
    h_bf16 = h_f32.astype(jnp.bfloat16)
    probs_bf16 = esmba_forward(h_bf16, attention_mask, weight, bias,
                               tile_s=32, seq_chunk=16)
    probs_bf16 = jax.block_until_ready(probs_bf16)
    ref_bf16 = reference(h_bf16)
    assert jnp.allclose(probs_bf16, ref_bf16, atol=1e-5, rtol=1e-5), (
        probs_bf16, ref_bf16)

    # f32 path (matches the PyTorch .to(float32) pipeline bit-for-bit math).
    probs_f32 = esmba_forward(h_f32, attention_mask, weight, bias,
                              tile_s=16, seq_chunk=8)
    probs_f32 = jax.block_until_ready(probs_f32)
    ref_f32 = reference(h_f32)
    assert jnp.allclose(probs_f32, ref_f32, atol=1e-5, rtol=1e-5), (
        probs_f32, ref_f32)

    print("KERNEL_OK")
</pallas_src>

<mosaic_0001>
module attributes {stable_mosaic.version = 11 : i64} {
  func.func @_esmba_kernel(%arg0: i32, %arg1: i32, %arg2: memref<2x1xi32, #tpu.memory_space<vmem>>, %arg3: memref<2x32x960xbf16, #tpu.memory_space<vmem>>, %arg4: memref<1x960xf32, #tpu.memory_space<vmem>>, %arg5: memref<1x1xf32, #tpu.memory_space<vmem>>, %arg6: memref<2x1xf32, #tpu.memory_space<vmem>>, %arg7: memref<2x960xf32, #tpu.memory_space<vmem>>) attributes {dimension_semantics = [#tpu.dimension_semantics<parallel>, #tpu.dimension_semantics<arbitrary>], iteration_bounds = array<i64: 1, 2>, scalar_prefetch = 0 : i64, scratch_operands = 1 : i64, tpu.core_type = #tpu.core_type<tc>, window_params = [{transform_indices = @transform_0, window_bounds = array<i64: 2, 1>}, {transform_indices = @transform_1, window_bounds = array<i64: 2, 32, 960>}, {pipeline_mode = #tpu.pipeline_mode<synchronous>, transform_indices = @transform_2, window_bounds = array<i64: 1, 960>}, {pipeline_mode = #tpu.pipeline_mode<synchronous>, transform_indices = @transform_3, window_bounds = array<i64: 1, 1>}, {transform_indices = @transform_4, window_bounds = array<i64: 2, 1>}]} {
    %c0_i32 = arith.constant 0 : i32
    %0 = arith.cmpi eq, %arg1, %c0_i32 : i32
    %1 = arith.extui %0 : i1 to i32
    %c0_i32_0 = arith.constant 0 : i32
    %2 = arith.cmpi ne, %1, %c0_i32_0 : i32
    scf.if %2 {
      %cst = arith.constant 0.000000e+00 : f32
      %10 = vector.broadcast %cst : f32 to vector<2x960xf32>
      %c0_6 = arith.constant 0 : index
      %c0_7 = arith.constant 0 : index
      %11 = vector.load %arg7[%c0_6, %c0_7] : memref<2x960xf32, #tpu.memory_space<vmem>>, vector<2x960xf32>
      tpu.vector_store %arg7[%c0_6, %c0_7], %10 {strides = array<i32>} : memref<2x960xf32, #tpu.memory_space<vmem>>, vector<2x960xf32>,
    } else {
    }
    %c0 = arith.constant 0 : index
    %c0_1 = arith.constant 0 : index
    %3 = vector.load %arg2[%c0, %c0_1] : memref<2x1xi32, #tpu.memory_space<vmem>>, vector<2x1xi32>
    %4 = vector.shape_cast %3 : vector<2x1xi32> to vector<2x1x1xi32>
    %c32_i32 = arith.constant 32 : i32
    %5 = arith.muli %arg1, %c32_i32 : i32
    %c0_i32_2 = arith.constant 0 : i32
    %c2_i32 = arith.constant 2 : i32
    %6 = arith.addi %c0_i32_2, %c2_i32 : i32
    %c1_i32 = arith.constant 1 : i32
    scf.for %arg8 = %c0_i32_2 to %6 step %c1_i32  : i32 {
      %c1_i32_6 = arith.constant 1 : i32
      %10 = arith.muli %arg8, %c1_i32_6 : i32
      %c0_i32_7 = arith.constant 0 : i32
      %11 = arith.addi %c0_i32_7, %10 : i32
      %c16_i32 = arith.constant 16 : i32
      %12 = arith.muli %11, %c16_i32 : i32
      %13 = tpu.assume_multiple %12, 8 : i32
      %c0_8 = arith.constant 0 : index
      %14 = arith.index_cast %13 : i32 to index
      %c0_9 = arith.constant 0 : index
      %15 = vector.load %arg3[%c0_8, %14, %c0_9] : memref<2x32x960xbf16, #tpu.memory_space<vmem>>, vector<2x16x960xbf16>
      %16 = arith.extf %15 : vector<2x16x960xbf16> to vector<2x16x960xf32>
      %17 = arith.addi %5, %13 : i32
      %18 = tpu.iota {dimensions = array<i32: 1>} : vector<2x16x1xi32>
      %19 = vector.broadcast %17 : i32 to vector<2x16x1xi32>
      %20 = arith.addi %19, %18 : vector<2x16x1xi32>
      %21 = vector.broadcast %4 : vector<2x1x1xi32> to vector<2x16x1xi32>
      %22 = arith.cmpi slt, %20, %21 : vector<2x16x1xi32>
      %23 = arith.extui %22 : vector<2x16x1xi1> to vector<2x16x1xi32>
      %24 = arith.sitofp %23 : vector<2x16x1xi32> to vector<2x16x1xf32>
      %c0_10 = arith.constant 0 : index
      %c0_11 = arith.constant 0 : index
      %25 = vector.load %arg7[%c0_10, %c0_11] : memref<2x960xf32, #tpu.memory_space<vmem>>, vector<2x960xf32>
      %26 = vector.broadcast %24 : vector<2x16x1xf32> to vector<2x16x960xf32>
      %27 = arith.mulf %16, %26 : vector<2x16x960xf32>
      %cst = arith.constant dense<0.000000e+00> : vector<2x960xf32>
      %28 = vector.multi_reduction <add>, %27, %cst [1] : vector<2x16x960xf32> to vector<2x960xf32>
      %29 = arith.addf %25, %28 : vector<2x960xf32>
      %c0_12 = arith.constant 0 : index
      %c0_13 = arith.constant 0 : index
      %30 = vector.load %arg7[%c0_12, %c0_13] : memref<2x960xf32, #tpu.memory_space<vmem>>, vector<2x960xf32>
      tpu.vector_store %arg7[%c0_12, %c0_13], %29 {strides = array<i32>} : memref<2x960xf32, #tpu.memory_space<vmem>>, vector<2x960xf32>,
    }
    %c2_i32_3 = arith.constant 2 : i32
    %c1_i32_4 = arith.constant 1 : i32
    %7 = arith.cmpi eq, %arg1, %c1_i32_4 : i32
    %8 = arith.extui %7 : i1 to i32
    %c0_i32_5 = arith.constant 0 : i32
    %9 = arith.cmpi ne, %8, %c0_i32_5 : i32
    scf.if %9 {
      %10 = arith.sitofp %3 : vector<2x1xi32> to vector<2x1xf32>
      %c0_6 = arith.constant 0 : index
      %c0_7 = arith.constant 0 : index
      %11 = vector.load %arg7[%c0_6, %c0_7] : memref<2x960xf32, #tpu.memory_space<vmem>>, vector<2x960xf32>
      %cst = arith.constant 9.99999993E-9 : f32
      %12 = vector.broadcast %cst : f32 to vector<2x1xf32>
      %13 = arith.addf %10, %12 : vector<2x1xf32>
      %14 = vector.broadcast %13 : vector<2x1xf32> to vector<2x960xf32>
      %15 = arith.divf %11, %14 : vector<2x960xf32>
      %c0_8 = arith.constant 0 : index
      %c0_9 = arith.constant 0 : index
      %16 = vector.load %arg4[%c0_8, %c0_9] : memref<1x960xf32, #tpu.memory_space<vmem>>, vector<1x960xf32>
      %17 = vector.broadcast %16 : vector<1x960xf32> to vector<2x960xf32>
      %18 = arith.mulf %15, %17 : vector<2x960xf32>
      %cst_10 = arith.constant dense<0.000000e+00> : vector<2xf32>
      %19 = vector.multi_reduction <add>, %18, %cst_10 [1] : vector<2x960xf32> to vector<2xf32>
      %20 = vector.shape_cast %19 : vector<2xf32> to vector<2x1xf32>
      %c0_11 = arith.constant 0 : index
      %c0_12 = arith.constant 0 : index
      %21 = vector.load %arg5[%c0_11, %c0_12] : memref<1x1xf32, #tpu.memory_space<vmem>>, vector<1x1xf32>
      %22 = vector.broadcast %21 : vector<1x1xf32> to vector<2x1xf32>
      %23 = arith.addf %20, %22 : vector<2x1xf32>
      %24 = arith.negf %23 : vector<2x1xf32>
      %25 = math.exp %24 : vector<2x1xf32>
      %cst_13 = arith.constant 1.000000e+00 : f32
      %26 = vector.broadcast %cst_13 : f32 to vector<2x1xf32>
      %27 = arith.addf %26, %25 : vector<2x1xf32>
      %28 = arith.divf %26, %27 : vector<2x1xf32>
      %c0_14 = arith.constant 0 : index
      %c0_15 = arith.constant 0 : index
      %29 = vector.load %arg6[%c0_14, %c0_15] : memref<2x1xf32, #tpu.memory_space<vmem>>, vector<2x1xf32>
      tpu.vector_store %arg6[%c0_14, %c0_15], %28 {strides = array<i32>} : memref<2x1xf32, #tpu.memory_space<vmem>>, vector<2x1xf32>,
    } else {
    }
    return
  }
  func.func @transform_0(%arg0: i32, %arg1: i32) -> (i32, i32) {
    %c0_i32 = arith.constant 0 : i32
    %c0_i32_0 = arith.constant 0 : i32
    return %arg0, %c0_i32 : i32, i32
  }
  func.func @transform_1(%arg0: i32, %arg1: i32) -> (i32, i32, i32) {
    %c0_i32 = arith.constant 0 : i32
    %c0_i32_0 = arith.constant 0 : i32
    return %arg0, %arg1, %c0_i32 : i32, i32, i32
  }
  func.func @transform_2(%arg0: i32, %arg1: i32) -> (i32, i32) {
    %c0_i32 = arith.constant 0 : i32
    %c0_i32_0 = arith.constant 0 : i32
    %c0_i32_1 = arith.constant 0 : i32
    return %c0_i32, %c0_i32_0 : i32, i32
  }
  func.func @transform_3(%arg0: i32, %arg1: i32) -> (i32, i32) {
    %c0_i32 = arith.constant 0 : i32
    %c0_i32_0 = arith.constant 0 : i32
    %c0_i32_1 = arith.constant 0 : i32
    return %c0_i32, %c0_i32_0 : i32, i32
  }
  func.func @transform_4(%arg0: i32, %arg1: i32) -> (i32, i32) {
    %c0_i32 = arith.constant 0 : i32
    %c0_i32_0 = arith.constant 0 : i32
    return %arg0, %c0_i32 : i32, i32
  }
}

</mosaic_0001>

<bundles_post_ra>
// kernel: tpu_custom_call.1
= control target key start
LH: loop header
LB: loop body
LE: loop exit
PB: predicated region body
PF: predicated region fallthrough
CT: control target
= control target key end

     0   :  { %s1450_s0 = inlined_call_operand.vmem [shape: s32[2,1], index: 0, kind: input, shape index: {}]   ;;  %s1451_s1 = inlined_call_operand.hbm [shape: bf16[2,64,960], index: 1, kind: input, shape index: {}]   ;;  %s1452_s2 = inlined_call_operand.vmem [shape: f32[1,960], index: 2, kind: input, shape index: {}]   ;;  %s1453_s3 = inlined_call_operand.<no memory space> [shape: f32[1,1], index: 3, kind: input, shape index: {}]   ;;  %s1454_s4 = inlined_call_operand.vmem [shape: f32[2,1], index: 4, kind: output, shape index: {}]  }
   0x1   :  { %v9_v0 = vstv %s1453_s3 }
   0x2   :  { %10 = vst [vmem:[#allocation3] sm:$0x1] %v9_v0 }
   0x3   :  { %11 = vsyncpa [#allocation5], 0 }
   0x4   :  { %13 = vsyncpa [#allocation5 + $0x1], 0  ;;  %s1188_s17 = smov 0   ;;  %s1190_s18 = smov 0  }
   0x5   :  { %s1192_s19 = smov 0   ;;  %s1194_s20 = smov 0  }
   0x6   :  { %s1196_s21 = smov 0   ;;  %s1198_s22 = smov 0  }
   0x7 LB: > { %s961_s3 = sadd.s32 4294967295, %s1141_s22   ;;  %s28_s23 = sadd.s32 1, %s1137_s21  ;;  %s1141_s22 = sphi %s1198_s22, %s19_s22   ;;  %s1137_s21 = sphi %s1196_s21, %s1461_s21   ;;  %s1133_s20 = sphi %s1194_s20, %s1460_s20   ;;  %s1129_s19 = sphi %s1192_s19, %s1459_s19   ;;  %s1125_s18 = sphi %s1190_s18, %s1458_s18   ;;  %s1121_s17 = sphi %s1188_s17, %s1457_s17  }
   0x8   : > { %p29_p0 = scmp.ge.s32.totalorder %s28_s23, 2  ;;  %s66_s24 = sadd.s32 1, %s1129_s19 }
   0x9   : > { %p73_p1 = scmp.ne.s32.totalorder %s1129_s19, %s1125_s18  ;;  %p74_p2 = scmp.eq.s32.totalorder %s1141_s22, 0 }
   0xa   : > { %s1463_s23 = smov (%p29_p0, %s28_s23), 0  ;;  %p79_p4 = scmp.ne.s32.totalorder %s1125_s18, %s1121_s17 }
   0xb   : > { %p1224_p3 = por %p74_p2, %p73_p1  ;;  %s62_s26 = ssub.s32 %s1137_s21, %s1463_s23 }
   0xc   : > { %p80_p5 = scmp.eq.s32.totalorder %s961_s3, 0  ;;  %p64_p6 = scmp.eq.s32.totalorder %s62_s26, 0 }
   0xd   : > { %p964_p8 = scmp.ge.s32.totalorder %s1141_s22, 2 }
   0xe   : > { %p1231_p7 = por %p80_p5, %p79_p4 }
   0xf   : > { %s1236_s28 = scalar_select %p64_p6, %s1129_s19, %s66_s24  }
  0x10   : > { %180 = sbr.rel (%p964_p8) target bundleno = 36 (0x24), region = 28 }
  0x17   : > { %s184_s29 = sand.u32 1, %s1129_s19   ;;  %s989_s30 = sshll.u32 %s1137_s21, 11 }
  0x18   : > { %s965_s5 = sshll.u32 %s184_s29, 8  ;;  %s198_s8 = scalar_lea.hbm %s1451_s1, %s989_s30 }
  0x19   : > { %s991_s9 = scalar_select %p1224_p3, [#allocation0], [#allocation8] }
  0x1a   : > { %s188_s10 = scalar_lea.vmem [#allocation4], %s965_s5  ;;  %s1147_s13 = smov 4096  }
  0x1b   : > { %s211_s11 = sshll.u32 %s188_s10, 4  ;;  %s203_s12 = sld [smem:[%s991_s9]]   ;;  %s212_s11 = int_to_ptr.vmem [resolvable:$true] %s211_s11 }
  0x1c   : > { %992 = sst [smem:[#allocation7]] (%p1224_p3), %s1147_s13  ;;  %s1148_s14 = smov 2048  }
  0x1d   : > { %993 = sst [smem:[#allocation7 + $0x1]] (%p1224_p3), %s1148_s14  ;;  %s1149_s15 = smov 4  }
  0x1e   : > { %994 = sst [smem:[#allocation7 + $0x2]] (%p1224_p3), %s1149_s15  ;;  %s1150_s16 = smov 512  }
  0x1f   : > { %995 = sst [smem:[#allocation7 + $0x3]] (%p1224_p3), %s1150_s16  ;;  %s1151_s3 = smov 32  }
  0x20   : > { %996 = sst [smem:[#allocation7 + $0x4]] (%p1224_p3), %s1150_s16  ;;  %s185_s26 = scalar_lea.sflag [#allocation5], %s184_s29 }
  0x21   : > { %s969_s17 = sshll.u32 %s203_s12, 26  ;;  %997 = sst [smem:[#allocation7 + $0x5]] (%p1224_p3), %s1151_s3 }
  0x22   : > { %s970_s24 = sadd.s32 134217728, %s969_s17  ;;  %s1152_s30 = smov [#allocation6]  }
  0x23   : > { %998 = dma.general (%p1224_p3), %s198_s8, 4096, %s212_s11, %s185_s26, %s1152_s30, [#allocation7], %s970_s24, 0  }
  0x24 PF: > { %p971_p9 = scmp.ge.s32.totalorder %s1141_s22, 1  ;;  %p232_p10 = scmp.lt.s32.totalorder %s1141_s22, 3 }
  0x26   : > { %p233_p11 = pnand %p971_p9, %p232_p10 }
  0x27   : > { %s238_s5 = sand.u32 (!%p233_p11), 1, %s1125_s18  }
  0x28   : > { %236 = sbr.rel (%p233_p11) target bundleno = 609 (0x261), region = 36  ;;  %s1263_s6 = sshll.u32 (!%p233_p11), %s238_s5, 8 }
  0x29   : > { %s239_s7 = scalar_lea.sflag (!%p233_p11), [#allocation5], %s238_s5  ;;  %s242_s9 = scalar_lea.vmem (!%p233_p11), [#allocation4], %s1263_s6 }
  0x2f   : > { %1116 = dma.done.wait (%p1231_p7), %s239_s7, 4096  }
  0x30   : > { %1118 = vsyncadd (%p1231_p7), %s239_s7, 4294963200  ;;  %p973_p12 = scmp.ne.s32.totalorder %s1133_s20, 0 }
  0x31   : > { %vm285_vm0 = vcmask (!%p973_p12), 1041408   ;;  %vm286_vm1 = vcmask (!%p973_p12), 1043458   ;;  %vm288_vm2 = vcmask (!%p973_p12), 1045508   ;;  %v1153_v1 = vmov (!%p973_p12), 0.0  }
  0x32   : > { %283 = sbr.rel (%p973_p12) target bundleno = 57 (0x39), region = 44  ;;  %284 = vst [vmem:[#allocation2] sm:$0xff] (!%p973_p12), %v1153_v1  ;;  %vm287_vm3 = vmor (!%p973_p12), %vm286_vm1, %vm285_vm0  ;;  %vm290_vm4 = vcmask (!%p973_p12), 523270  }
  0x33   : > { %vm289_vm5 = vmor (!%p973_p12), %vm288_vm2, %vm287_vm3 }
  0x34   : > { %vm291_vm6 = vmor (!%p973_p12), %vm290_vm4, %vm289_vm5 }
  0x35   : > { %292 = vst.msk [vmem:[#allocation2 + $0x8] sm:$0xff] (!%p973_p12), %vm291_vm6, %v1153_v1 }
  0x39 PF: > { %v297_v2 = vlaneseq  ;;  %s974_s25 = sshll.u32 %s1133_s20, 5  ;;  %v1154_v3 = vmov 1966171168   ;;  %v1277_v7 = vld [vmem:[%s1450_s0] sm:$0x3]  ;;  %s1293_s8 = smov 0  }
  0x3a   : > { %v295_v4 = vunpack.c.l.s4 %v1154_v3 }
  0x3b   : > { %v1272_v5 = vshrl.u32 %v297_v2, 7 }
  0x3c   : > { %v296_v6 = vunpack.c.0.s8 %v295_v4 }
  0x3e   : > { %v1280_v8 = vsub.s32 %v296_v6, %v1272_v5 }
  0x40   : > { %v1284_v9 = vrot.slane %v1277_v7, %v1280_v8 }
  0x42   : > { %v301_v10 = vcombine.high %v1284_v9, %v1284_v9  ;;  %v308_v11 = vrot.slane %v1284_v9, %v1280_v8 }
  0x44   : > { %v1291_v12 = vrot.slane %v301_v10, %v1280_v8 }
  0x45 LB: >> { %v1299_v13 = vsub.s32 0, %v1272_v5  ;;  %v1155_v14 = vmov 0   ;;  %v380_v15 = vadd.s32 8, %v1272_v5  ;;  %s975_s10 = sshll.u32 %s1145_s8, 4  ;;  %v1156_v21 = vmov 0.0   ;;  %s322_s8 = sadd.s32 1, %s1145_s8   ;;  %s1145_s8 = sphi %s1293_s8, %s322_s8  }
  0x46   : >> { %1069 = vset.pattern.permute.xlu0 %v1155_v14  ;;  %s377_s11 = sadd.s32 %s975_s10, %s974_s25  ;;  %s324_s12 = sshra.s32 %s975_s10, 3  ;;  %v1157_v28 = vmov 1983009808   ;;  %vm507_vm11 = vcmask 523264   ;;  %vm664_vm12 = vcmask 1041409   ;;  %vm666_vm13 = vcmask 1043459  }
  0x47   : >> { %v391_v16 = vrot.slane %v1291_v12, %v1299_v13  ;;  %v387_v17 = vrot.slane %v308_v11, %v1299_v13  ;;  %v381_v18 = vstv %s377_s11  ;;  %s990_s13 = sshll.u32 %s324_s12, 5  ;;  %v594_v29 = vunpack.c.l.s4 %v1157_v28  ;;  %p319_p13 = scmp.ge.s32.totalorder %s322_s8, 2  }
  0x48   : >> { %v382_v19 = vadd.s32 %v381_v18, %v1272_v5  ;;  %v383_v20 = vadd.s32 %v381_v18, %v380_v15  ;;  %s1314_s14 = scalar_lea.vmem %s242_s9, %s990_s13 [#allocation4]  ;;  %vm668_vm14 = vcmask 1045509   ;;  %vm670_vm15 = vcmask 1047559   ;;  %p982_p0 = scmp.ne.s32.totalorder (%p319_p13), %s1133_s20, 1 }
  0x49   : >> { %v595_v30 = vunpack.c.0.s8 %v594_v29  ;;  %v337_v31 = vld [vmem:[%s1314_s14 + $0x80] sm:$0xff]  ;;  %v338_v32 = vld [vmem:[%s1314_s14 + $0x88] sm:$0xff]  ;;  %v339_v33 = vld [vmem:[%s1314_s14 + $0x90] sm:$0xff]  ;;  %vm684_vm0 = vcmask 1041408   ;;  %vm685_vm1 = vcmask 1043458   ;;  %vm687_vm3 = vcmask 1045508  }
  0x4a   : >> { %vm394_vm7 = vcmp.lt.s32.totalorder %v382_v19, %v391_v16  ;;  %vm395_vm8 = vcmp.lt.s32.totalorder %v383_v20, %v391_v16  ;;  %vm392_vm9 = vcmp.lt.s32.totalorder %v382_v19, %v387_v17  ;;  %vm393_vm10 = vcmp.lt.s32.totalorder %v383_v20, %v387_v17  ;;  %v340_v34 = vld [vmem:[%s1314_s14 + $0x98] sm:$0xff]  ;;  %v341_v35 = vld [vmem:[%s1314_s14 + $0xa0] sm:$0xff]  ;;  %v342_v36 = vld [vmem:[%s1314_s14 + $0xa8] sm:$0xff] }
  0x4b   : >> { %v980_v22 = vsel %vm394_vm7, 1.0, %v1156_v21  ;;  %v981_v23 = vsel %vm395_vm8, 1.0, %v1156_v21  ;;  %v978_v24 = vsel %vm392_vm9, 1.0, %v1156_v21  ;;  %v979_v25 = vsel %vm393_vm10, 1.0, %v1156_v21  ;;  %v343_v38 = vld [vmem:[%s1314_s14 + $0xb0] sm:$0xff]  ;;  %v344_v39 = vld [vmem:[%s1314_s14 + $0xb8] sm:$0xff]  ;;  %vm686_vm2 = vmor %vm685_vm1, %vm684_vm0 }
  0x4c   : >> { %v1070_v26 = vpack.i.bf16 %v981_v23, %v980_v22  ;;  %v1075_v27 = vpack.i.bf16 %v979_v25, %v978_v24  ;;  %v1323_v37 = vsub.s32 %v595_v30, %v1272_v5  ;;  %v361_v40 = vunpack.c.l.bf16 %v337_v31  ;;  %v1328_v47 = vld [vmem:[%s1314_s14] sm:$0xff]  ;;  %v1331_v52 = vld [vmem:[%s1314_s14 + $0x8] sm:$0xff]  ;;  %v1334_v53 = vld [vmem:[%s1314_s14 + $0x10] sm:$0xff] }
  0x4d   : >> { %v362_v41 = vunpack.c.h.bf16 %v337_v31  ;;  %v363_v42 = vunpack.c.l.bf16 %v338_v32  ;;  %v364_v43 = vunpack.c.h.bf16 %v338_v32  ;;  %v365_v44 = vunpack.c.l.bf16 %v339_v33  ;;  %vm688_vm4 = vmor %vm687_vm3, %vm686_vm2 }
  0x4e   : >> { %1071 = vperm.xlu0 %1069, %v1070_v26   ;;  %v366_v45 = vunpack.c.h.bf16 %v339_v33  ;;  %v367_v46 = vunpack.c.l.bf16 %v340_v34  ;;  %v368_v48 = vunpack.c.h.bf16 %v340_v34  ;;  %v369_v49 = vunpack.c.l.bf16 %v341_v35 }
  0x4f   : >> { %v370_v50 = vunpack.c.h.bf16 %v341_v35  ;;  %v371_v51 = vunpack.c.l.bf16 %v342_v36  ;;  %v372_v55 = vunpack.c.h.bf16 %v342_v36  ;;  %v373_v56 = vunpack.c.l.bf16 %v343_v38 }
  0x50   : >> { %v374_v57 = vunpack.c.h.bf16 %v343_v38  ;;  %v375_v58 = vunpack.c.l.bf16 %v344_v39  ;;  %v376_v61 = vunpack.c.h.bf16 %v344_v39  ;;  %v345_v62 = vunpack.c.l.bf16 %v1328_v47 }
  0x51   : >> { %v346_v63 = vunpack.c.h.bf16 %v1328_v47  ;;  %v347_v0 = vunpack.c.l.bf16 %v1331_v52  ;;  %v348_v1 = vunpack.c.h.bf16 %v1331_v52  ;;  %v349_v2 = vunpack.c.l.bf16 %v1334_v53 }
  0x52   : >> { %1076 = vperm.xlu0 %1069, %v1075_v27   ;;  %vm689_vm5 = vcmask 523270  }
  0x53   : >> { %vm690_vm6 = vmor %vm689_vm5, %vm688_vm4 }
  0xcd   : >> { %v1072_v54 = vpop.permute.xlu0 %1071 }
  0xce   : >> { %v1074_v59 = vunpack.i.h.bf16 %v1072_v54  ;;  %v1073_v60 = vunpack.i.l.bf16 %v1072_v54 }
  0xd0   : >> { %v442_v3 = vmul.f32 %v1073_v60, %v361_v40  ;;  %v443_v4 = vmul.f32 %v1073_v60, %v362_v41  ;;  %v444_v6 = vmul.f32 %v1073_v60, %v363_v42  ;;  %v445_v10 = vmul.f32 %v1073_v60, %v364_v43 }
  0xd1   : >> { %v446_v14 = vmul.f32 %v1073_v60, %v365_v44  ;;  %v447_v15 = vmul.f32 %v1073_v60, %v366_v45  ;;  %v448_v16 = vmul.f32 %v1073_v60, %v367_v46  ;;  %v449_v17 = vmul.f32 %v1073_v60, %v368_v48 }
  0xd2   : >> { %v450_v18 = vmul.f32 %v1074_v59, %v369_v49  ;;  %v451_v19 = vmul.f32 %v1074_v59, %v370_v50  ;;  %v452_v20 = vmul.f32 %v1074_v59, %v371_v51  ;;  %v453_v21 = vmul.f32 %v1074_v59, %v372_v55 }
  0xd3   : >> { %v454_v22 = vmul.f32 %v1074_v59, %v373_v56  ;;  %v455_v23 = vmul.f32 %v1074_v59, %v374_v57  ;;  %v456_v24 = vmul.f32 %v1074_v59, %v375_v58  ;;  %v457_v25 = vmul.f32 %v1074_v59, %v376_v61 }
  0xd4   : >> { %v517_v26 = vadd.f32 %v450_v18, %v442_v3  ;;  %v524_v27 = vadd.f32 %v451_v19, %v443_v4  ;;  %v531_v28 = vadd.f32 %v452_v20, %v444_v6  ;;  %v538_v29 = vadd.f32 %v453_v21, %v445_v10 }
  0xd5   : >> { %v545_v30 = vadd.f32 %v454_v22, %v446_v14  ;;  %v552_v31 = vadd.f32 %v455_v23, %v447_v15  ;;  %v559_v32 = vadd.f32 %v456_v24, %v448_v16  ;;  %v566_v33 = vsel %vm507_vm11, %v449_v17, 0.0  ;;  %v1344_v14 = vld [vmem:[%s1314_s14 + $0x18] sm:$0xff]  ;;  %v333_v15 = vld [vmem:[%s1314_s14 + $0x20] sm:$0xff]  ;;  %v1077_v24 = vpop.permute.xlu0 %1076 }
  0xd6   : >> { %v518_v34 = vrot.slane %v517_v26, 4  ;;  %v525_v35 = vrot.slane %v524_v27, 4  ;;  %v532_v36 = vrot.slane %v531_v28, 4  ;;  %v539_v38 = vrot.slane %v538_v29, 4 }
  0xd7   : >> { %v546_v39 = vrot.slane %v545_v30, 4  ;;  %v553_v40 = vrot.slane %v552_v31, 4  ;;  %v560_v41 = vrot.slane %v559_v32, 4  ;;  %v567_v42 = vsel %vm507_vm11, %v457_v25, 0.0  ;;  %v334_v25 = vld [vmem:[%s1314_s14 + $0x28] sm:$0xff] }
  0xd8   : >> { %v519_v43 = vadd.f32 %v518_v34, %v517_v26  ;;  %v526_v44 = vadd.f32 %v525_v35, %v524_v27  ;;  %v533_v45 = vadd.f32 %v532_v36, %v531_v28  ;;  %v540_v46 = vadd.f32 %v539_v38, %v538_v29  ;;  %v335_v34 = vld [vmem:[%s1314_s14 + $0x30] sm:$0xff]  ;;  %v336_v35 = vld [vmem:[%s1314_s14 + $0x38] sm:$0xff] }
  0xd9   : >> { %v547_v48 = vadd.f32 %v546_v39, %v545_v30  ;;  %v554_v49 = vadd.f32 %v553_v40, %v552_v31  ;;  %v561_v50 = vadd.f32 %v560_v41, %v559_v32  ;;  %v568_v51 = vadd.f32 %v567_v42, %v566_v33 }
  0xda   : >> { %v520_v54 = vrot.slane %v519_v43, 2  ;;  %v527_v55 = vrot.slane %v526_v44, 2  ;;  %v534_v56 = vrot.slane %v533_v45, 2  ;;  %v541_v57 = vrot.slane %v540_v46, 2 }
  0xdb   : >> { %v548_v58 = vrot.slane %v547_v48, 2  ;;  %v555_v59 = vrot.slane %v554_v49, 2  ;;  %v562_v60 = vrot.slane %v561_v50, 2  ;;  %v569_v61 = vrot.slane %v568_v51, 4 }
  0xdc   : >> { %v521_v3 = vadd.f32 %v520_v54, %v519_v43  ;;  %v528_v4 = vadd.f32 %v527_v55, %v526_v44  ;;  %v535_v6 = vadd.f32 %v534_v56, %v533_v45  ;;  %v542_v10 = vadd.f32 %v541_v57, %v540_v46 }
  0xdd   : >> { %v549_v16 = vadd.f32 %v548_v58, %v547_v48  ;;  %v556_v17 = vadd.f32 %v555_v59, %v554_v49  ;;  %v563_v18 = vadd.f32 %v562_v60, %v561_v50  ;;  %v570_v19 = vadd.f32 %v569_v61, %v568_v51 }
  0xde   : >> { %v522_v20 = vrot.slane %v521_v3, 1  ;;  %v529_v21 = vrot.slane %v528_v4, 1  ;;  %v536_v22 = vrot.slane %v535_v6, 1  ;;  %v543_v23 = vrot.slane %v542_v10, 1 }
  0xdf   : >> { %v350_v26 = vunpack.c.h.bf16 %v1334_v53  ;;  %v351_v27 = vunpack.c.l.bf16 %v1344_v14  ;;  %v352_v28 = vunpack.c.h.bf16 %v1344_v14  ;;  %v353_v29 = vunpack.c.l.bf16 %v333_v15 }
  0xe0   : >> { %v550_v30 = vrot.slane %v549_v16, 1  ;;  %v557_v31 = vrot.slane %v556_v17, 1  ;;  %v564_v32 = vrot.slane %v563_v18, 1  ;;  %v571_v33 = vrot.slane %v570_v19, 2 }
  0xe1   : >> { %v523_v36 = vadd.f32 %v522_v20, %v521_v3  ;;  %v530_v38 = vadd.f32 %v529_v21, %v528_v4  ;;  %v537_v39 = vadd.f32 %v536_v22, %v535_v6  ;;  %v544_v40 = vadd.f32 %v543_v23, %v542_v10 }
  0xe2   : >> { %v1078_v41 = vunpack.i.l.bf16 %v1077_v24  ;;  %v354_v42 = vunpack.c.h.bf16 %v333_v15  ;;  %v355_v43 = vunpack.c.l.bf16 %v334_v25  ;;  %v356_v44 = vunpack.c.h.bf16 %v334_v25 }
  0xe3   : >> { %v1079_v45 = vunpack.i.h.bf16 %v1077_v24  ;;  %v357_v46 = vunpack.c.l.bf16 %v335_v34  ;;  %v358_v48 = vunpack.c.h.bf16 %v335_v34  ;;  %v359_v49 = vunpack.c.l.bf16 %v336_v35 }
  0xe4   : >> { %v1353_v50 = vadd.f32 %v550_v30, %v549_v16  ;;  %v1355_v51 = vadd.f32 %v557_v31, %v556_v17  ;;  %v572_v54 = vadd.f32 %v571_v33, %v570_v19  ;;  %v360_v55 = vunpack.c.h.bf16 %v336_v35 }
  0xe5   : >> { %v1357_v56 = vadd.f32 %v564_v32, %v563_v18  ;;  %v625_v57 = vcombine.low %v523_v36, %v530_v38  ;;  %v626_v58 = vcombine.low %v537_v39, %v544_v40  ;;  %v426_v59 = vmul.f32 %v1078_v41, %v345_v62 }
  0xe6   : >> { %v427_v60 = vmul.f32 %v1078_v41, %v346_v63  ;;  %v428_v61 = vmul.f32 %v1078_v41, %v347_v0  ;;  %v429_v3 = vmul.f32 %v1078_v41, %v348_v1  ;;  %v430_v4 = vmul.f32 %v1078_v41, %v349_v2 }
  0xe7   : >> { %v431_v6 = vmul.f32 %v1078_v41, %v350_v26  ;;  %v432_v10 = vmul.f32 %v1078_v41, %v351_v27  ;;  %v434_v14 = vmul.f32 %v1079_v45, %v353_v29  ;;  %v435_v15 = vmul.f32 %v1079_v45, %v354_v42 }
  0xe8   : >> { %v573_v16 = vrot.slane %v572_v54, 1  ;;  %v436_v17 = vmul.f32 %v1079_v45, %v355_v43  ;;  %v437_v18 = vmul.f32 %v1079_v45, %v356_v44  ;;  %v438_v62 = vmul.f32 %v1079_v45, %v357_v46 }
  0xe9   : >> { %v1370_v47 = vrot.slane %v625_v57, %v1323_v37  ;;  %v1373_v63 = vrot.slane %v626_v58, %v1323_v37  ;;  %v439_v0 = vmul.f32 %v1079_v45, %v358_v48  ;;  %v440_v52 = vmul.f32 %v1079_v45, %v359_v49 }
  0xea   : >> { %v458_v1 = vadd.f32 %v434_v14, %v426_v59  ;;  %v465_v19 = vadd.f32 %v435_v15, %v427_v60  ;;  %v472_v53 = vadd.f32 %v436_v17, %v428_v61  ;;  %v479_v2 = vadd.f32 %v437_v18, %v429_v3 }
  0xeb   : >> { %v433_v20 = vmul.f32 %v1078_v41, %v352_v28  ;;  %v486_v21 = vadd.f32 %v438_v62, %v430_v4  ;;  %v493_v22 = vadd.f32 %v439_v0, %v431_v6  ;;  %v500_v23 = vadd.f32 %v440_v52, %v432_v10 }
  0xec   : >> { %v459_v24 = vrot.slane %v458_v1, 4  ;;  %v466_v25 = vrot.slane %v465_v19, 4  ;;  %v473_v26 = vrot.slane %v472_v53, 4  ;;  %v480_v27 = vrot.slane %v479_v2, 4 }
  0xed   : >> { %v441_v29 = vmul.f32 %v1079_v45, %v360_v55  ;;  %v487_v30 = vrot.slane %v486_v21, 4  ;;  %v494_v31 = vrot.slane %v493_v22, 4  ;;  %v501_v32 = vrot.slane %v500_v23, 4 }
  0xee   : >> { %v460_v33 = vadd.f32 %v459_v24, %v458_v1  ;;  %v467_v34 = vadd.f32 %v466_v25, %v465_v19  ;;  %v474_v35 = vadd.f32 %v473_v26, %v472_v53  ;;  %v481_v36 = vadd.f32 %v480_v27, %v479_v2 }
  0xef   : >> { %v488_v38 = vadd.f32 %v487_v30, %v486_v21  ;;  %v495_v39 = vadd.f32 %v494_v31, %v493_v22  ;;  %v502_v40 = vadd.f32 %v501_v32, %v500_v23  ;;  %v508_v28 = vsel %vm507_vm11, %v433_v20, 0.0 }
  0xf0   : >> { %v461_v41 = vrot.slane %v460_v33, 2  ;;  %v468_v42 = vrot.slane %v467_v34, 2  ;;  %v475_v43 = vrot.slane %v474_v35, 2  ;;  %v482_v44 = vrot.slane %v481_v36, 2 }
  0xf1   : >> { %v489_v46 = vrot.slane %v488_v38, 2  ;;  %v496_v48 = vrot.slane %v495_v39, 2  ;;  %v503_v49 = vrot.slane %v502_v40, 2  ;;  %v509_v45 = vsel %vm507_vm11, %v441_v29, 0.0 }
  0xf2   : >> { %v462_v55 = vadd.f32 %v461_v41, %v460_v33  ;;  %v469_v57 = vadd.f32 %v468_v42, %v467_v34  ;;  %v476_v58 = vadd.f32 %v475_v43, %v474_v35  ;;  %v483_v59 = vadd.f32 %v482_v44, %v481_v36  ;;  %v404_v34 = vld [vmem:[#allocation2] sm:$0xff] }
  0xf3   : >> { %v574_v60 = vadd.f32 %v573_v16, %v572_v54  ;;  %v490_v61 = vadd.f32 %v489_v46, %v488_v38  ;;  %v497_v3 = vadd.f32 %v496_v48, %v495_v39  ;;  %v510_v4 = vadd.f32 %v509_v45, %v508_v28 }
  0xf4   : >> { %v463_v6 = vrot.slane %v462_v55, 1  ;;  %v470_v10 = vrot.slane %v469_v57, 1  ;;  %v477_v14 = vrot.slane %v476_v58, 1  ;;  %v484_v15 = vrot.slane %v483_v59, 1 }
  0xf5   : >> { %v491_v17 = vrot.slane %v490_v61, 1  ;;  %v498_v18 = vrot.slane %v497_v3, 1  ;;  %v504_v62 = vadd.f32 %v503_v49, %v502_v40  ;;  %v511_v0 = vrot.slane %v510_v4, 4  ;;  %v405_v49 = vld [vmem:[#allocation2 + $0x8] sm:$0xff] }
  0xf6   : >> { %v464_v52 = vadd.f32 %v463_v6, %v462_v55  ;;  %v471_v1 = vadd.f32 %v470_v10, %v469_v57  ;;  %v478_v19 = vadd.f32 %v477_v14, %v476_v58  ;;  %v485_v53 = vadd.f32 %v484_v15, %v483_v59 }
  0xf7   : >> { %v642_v2 = vcombine.low %v1353_v50, %v1355_v51  ;;  %v512_v20 = vadd.f32 %v511_v0, %v510_v4  ;;  %v641_v54 = vcombine.low %v1370_v47, %v1373_v63  ;;  %v643_v16 = vcombine.low %v1357_v56, %v574_v60 }
  0xf8   : >> { %v591_v21 = vcombine.low %v464_v52, %v471_v1  ;;  %v592_v22 = vcombine.low %v478_v19, %v485_v53  ;;  %v492_v23 = vadd.f32 %v491_v17, %v490_v61  ;;  %v499_v24 = vadd.f32 %v498_v18, %v497_v3 }
  0xf9   : >> { %v505_v25 = vrot.slane %v504_v62, 1  ;;  %v513_v26 = vrot.slane %v512_v20, 2  ;;  %v650_v50 = vrot.slane %v642_v2, %v1323_v37  ;;  %v663_v51 = vrot.slane %v641_v54, 7 }
  0xfa   : >> { %v599_v27 = vrot.slane %v591_v21, %v1323_v37  ;;  %v606_v29 = vrot.slane %v592_v22, %v1323_v37  ;;  %v657_v56 = vrot.slane %v643_v16, %v1323_v37  ;;  %v608_v32 = vcombine.low %v492_v23, %v499_v24 }
  0xfb   : >> { %v514_v30 = vadd.f32 %v513_v26, %v512_v20  ;;  %v506_v63 = vadd.f32 %v505_v25, %v504_v62 }
  0xfc   : >> { %v607_v47 = vcombine.low %v599_v27, %v606_v29  ;;  %v658_v39 = vcombine.low %v650_v50, %v657_v56  ;;  %v616_v28 = vrot.slane %v608_v32, %v1323_v37 }
  0xfd   : >> { %v515_v31 = vrot.slane %v514_v30, 1 }
  0xfe   : >> { %v665_v33 = vsel %vm664_vm12, %v663_v51, %v607_v47  ;;  %v674_v44 = vrot.slane %v658_v39, 7 }
  0xff   : >> { %v516_v35 = vadd.f32 %v515_v31, %v514_v30  ;;  %v667_v36 = vsel %vm666_vm13, %v663_v51, %v665_v33 }
 0x100   : >> { %v669_v38 = vsel %vm668_vm14, %v663_v51, %v667_v36 }
 0x101   : >> { %v609_v40 = vcombine.low %v506_v63, %v516_v35  ;;  %v671_v41 = vsel %vm670_vm15, %v663_v51, %v669_v38 }
 0x102   : >> { %v681_v42 = vadd.f32 %v671_v41, %v404_v34 }
 0x103   : >> { %v623_v43 = vrot.slane %v609_v40, %v1323_v37 }
 0x104   : >> { %683 = vst [vmem:[#allocation2] sm:$0xff] %v681_v42 }
 0x105   : >> { %v624_v46 = vcombine.low %v616_v28, %v623_v43 }
 0x107   : >> { %v675_v48 = vsel %vm664_vm12, %v674_v44, %v624_v46  ;;  %321 = sbr.rel (!%p319_p13) target bundleno = 69 (0x45), region = 100 }
 0x108   : >> { %v676_v45 = vsel %vm666_vm13, %v674_v44, %v675_v48 }
 0x109   : >> { %v677_v55 = vsel %vm668_vm14, %v674_v44, %v676_v45 }
 0x10a   : >> { %v678_v57 = vsel %vm670_vm15, %v674_v44, %v677_v55 }
 0x10b   : >> { %v682_v58 = vadd.f32 %v678_v57, %v405_v49 }
 0x10d   : >> { %691 = vst.msk [vmem:[#allocation2 + $0x8] sm:$0xff] %vm690_vm6, %v682_v58 }
 0x10e   : > { %695 = sbr.rel (%p982_p0) target bundleno = 609 (0x261), region = 55  ;;  %v696_v59 = vcvt.s32.f32 (!%p982_p0), %v1277_v7  ;;  %v1158_v60 = vmov (!%p982_p0), 0   ;;  %v1159_v3 = vmov (!%p982_p0), 269488144   ;;  %v715_v10 = vld [vmem:[%s1452_s2] sm:$0xff] (!%p982_p0)  ;;  %v723_v14 = vsub.s32 (!%p982_p0), 1, %v1272_v5 }
 0x10f   : > { %1080 = vset.pattern.permute.xlu0 (!%p982_p0), %v1158_v60  ;;  %v705_v4 = vunpack.c.l.s4 (!%p982_p0), %v1159_v3  ;;  %v727_v15 = vsub.s32 (!%p982_p0), 2, %v1272_v5  ;;  %v731_v8 = vsub.s32 (!%p982_p0), 3, %v1272_v5  ;;  %v735_v9 = vsub.s32 (!%p982_p0), 4, %v1272_v5  ;;  %v697_v26 = vld [vmem:[#allocation2] sm:$0xff] (!%p982_p0) }
 0x110   : > { %v699_v61 = vadd.f32 (!%p982_p0), 1e-08, %v696_v59  ;;  %v739_v11 = vsub.s32 (!%p982_p0), 5, %v1272_v5  ;;  %v743_v12 = vsub.s32 (!%p982_p0), 6, %v1272_v5  ;;  %v747_v17 = vsub.s32 (!%p982_p0), 7, %v1272_v5 }
 0x111   : > { %v706_v6 = vunpack.c.0.s8 (!%p982_p0), %v705_v4  ;;  %v720_v18 = vrot.slane (!%p982_p0), %v715_v10, %v1299_v13  ;;  %v724_v62 = vrot.slane (!%p982_p0), %v715_v10, %v723_v14  ;;  %v728_v0 = vrot.slane (!%p982_p0), %v715_v10, %v727_v15  ;;  %v983_v4 = vld [vmem:[#allocation3] ss:$0 sm:$0xff] (!%p982_p0) }
 0x112   : > { %702 = vperm.xlu0 (!%p982_p0), %1080, %v699_v61   ;;  %v732_v52 = vrot.slane (!%p982_p0), %v715_v10, %v731_v8  ;;  %v736_v19 = vrot.slane (!%p982_p0), %v715_v10, %v735_v9  ;;  %v740_v2 = vrot.slane (!%p982_p0), %v715_v10, %v739_v11  ;;  %v744_v20 = vrot.slane (!%p982_p0), %v715_v10, %v743_v12 }
 0x113   : > { %v709_v7 = vsub.s32 (!%p982_p0), %v706_v6, %v1272_v5  ;;  %v748_v54 = vrot.slane (!%p982_p0), %v715_v10, %v747_v17  ;;  %v749_v16 = vcombine.low (!%p982_p0), %v720_v18, %v724_v62  ;;  %vm845_vm7 = vcmask (!%p982_p0), 517120  }
 0x114   : > { %v750_v21 = vcombine.low (!%p982_p0), %v728_v0, %v732_v52  ;;  %v766_v22 = vcombine.low (!%p982_p0), %v736_v19, %v740_v2  ;;  %v698_v27 = vld [vmem:[#allocation2 + $0x8] sm:$0xff] (!%p982_p0)  ;;  %vm864_vm8 = vcmask (!%p982_p0), 1024  }
 0x115   : > { %v767_v23 = vcombine.low %v744_v20, %v748_v54  ;;  %v757_v24 = vrot.slane %v749_v16, %v1323_v37 }
 0x116   : > { %v764_v5 = vrot.slane %v750_v21, %v1323_v37  ;;  %v774_v13 = vrot.slane %v766_v22, %v1323_v37 }
 0x117   : > { %v781_v25 = vrot.slane %v767_v23, %v1323_v37 }
 0x118   : > { %v765_v29 = vcombine.low %v757_v24, %v764_v5 }
 0x119   : > { %v782_v50 = vcombine.low %v774_v13, %v781_v25 }
 0x191   : > { %v703_v1 = vpop.permute.xlu0 %702 }
 0x192   : > { %v710_v53 = vrot.slane %v703_v1, %v709_v7 }
 0x194   : > { %1081 = vrcp.f32 %v710_v53 }
 0x19e   : > { %v1082_v30 = vpop.eup %1081 }
 0x19f   : > { %v713_v51 = vmul.f32 %v1082_v30, %v697_v26  ;;  %v714_v47 = vmul.f32 %v1082_v30, %v698_v27 }
 0x1a1   : > { %v785_v56 = vmul.f32 %v765_v29, %v713_v51  ;;  %v786_v63 = vmul.f32 %v782_v50, %v714_v47 }
 0x1a3   : > { %v796_v31 = vrot.slane %v785_v56, %v1323_v37  ;;  %v789_v32 = vcombine.high %v785_v56, %v785_v56  ;;  %v806_v35 = vcombine.high %v786_v63, %v786_v63  ;;  %v813_v38 = vrot.slane %v786_v63, %v1323_v37 }
 0x1a5   : > { %v803_v33 = vrot.slane %v789_v32, %v1323_v37  ;;  %v804_v34 = vcombine.high %v796_v31, %v796_v31  ;;  %v832_v39 = vsel %vm684_vm0, %v796_v31, 0.0  ;;  %v820_v43 = vrot.slane %v806_v35, %v1323_v37 }
 0x1a6   : > { %v821_v44 = vcombine.high %v813_v38, %v813_v38  ;;  %v839_v49 = vsel %vm684_vm0, %v813_v38, 0.0 }
 0x1a7   : > { %v805_v36 = vcombine.high %v803_v33, %v803_v33  ;;  %v833_v40 = vsel %vm684_vm0, %v804_v34, 0.0  ;;  %v835_v41 = vsel %vm684_vm0, %v803_v33, 0.0  ;;  %v822_v55 = vcombine.high %v820_v43, %v820_v43 }
 0x1a8   : > { %v834_v28 = vadd.f32 %v833_v40, %v832_v39  ;;  %v841_v57 = vsel %vm684_vm0, %v821_v44, 0.0  ;;  %v843_v59 = vsel %vm684_vm0, %v820_v43, 0.0 }
 0x1a9   : > { %v837_v46 = vsel %vm684_vm0, %v805_v36, 0.0  ;;  %v846_v61 = vsel %vm845_vm7, %v822_v55, 0.0 }
 0x1aa   : > { %v836_v42 = vadd.f32 %v835_v41, %v834_v28 }
 0x1ac   : > { %v838_v48 = vadd.f32 %v837_v46, %v836_v42 }
 0x1ae   : > { %v840_v45 = vadd.f32 %v839_v49, %v838_v48 }
 0x1b0   : > { %v842_v58 = vadd.f32 %v841_v57, %v840_v45 }
 0x1b2   : > { %v844_v60 = vadd.f32 %v843_v59, %v842_v58 }
 0x1b4   : > { %v847_v3 = vadd.f32 %v846_v61, %v844_v60 }
 0x1b6   : > { %848 = vadd.xlane.f32.xlu0 %v847_v3 }
 0x243   : > { %v849_v37 = vpop.xlane.xlu0 %848 }
 0x244   : > { %v857_v6 = vadd.f32 %v983_v4, %v849_v37 }
 0x246   : > { %v984_v10 = vmul.f32 -1.442695, %v857_v6 }
 0x248   : > { %1083 = vpow2.f32 %v984_v10 }
 0x252   : > { %v1084_v14 = vpop.eup %1083 }
 0x253   : > { %v861_v15 = vadd.f32 1.0, %v1084_v14 }
 0x255   : > { %1085 = vrcp.f32 %v861_v15 }
 0x25f   : > { %v1086_v8 = vpop.eup %1085 }
 0x260   : > { %865 = vst.msk [vmem:[%s1454_s4] sm:$0x3] %vm864_vm8, %v1086_v8 }
 0x261 PF: > { %s19_s22 = sadd.s32 1, %s1141_s22   ;;  %s1457_s17 = smov %s1125_s18 }
 0x262   : > { %p16_p1 = scmp.ge.s32.totalorder %s19_s22, 4   ;;  %s1458_s18 = smov %s1129_s19 }
 0x263   : > { %s1459_s19 = smov %s1236_s28  ;;  %s1460_s20 = smov %s1137_s21 }
 0x264   : > { %s1461_s21 = smov %s1463_s23  ;;  %18 = sbr.rel (!%p16_p1) target bundleno = 7 (0x7), region = 111 }
 0x26b   :  { %885 = vsyncpa [#allocation5], 1 }
 0x26c   :  { %887 = vsyncpa [#allocation5 + $0x1], 1 }

</bundles_post_ra>
